<compile_context>
chip_gen: v6e
topology: v6e:2x2x1
jax: 0.10.0
libtpu: 0.0.40
codegen_flags: <defaults>
</compile_context>

<pallas_src>
import jax
import jax.numpy as jnp
from jax.experimental import pallas as pl
from jax.experimental.pallas import tpu as pltpu

# Problem constants (from the PyTorch module)
CHAR_EMB = 50                        # in_channels (e_char)
KERNEL_SIZE = 5
M_WORD = 21                          # input length
OUT_FEATURES = 32                    # out_channels (e_word) -- small synthetic choice
L_OUT = M_WORD - KERNEL_SIZE + 1     # 17 conv positions (== maxpool window)
KC = KERNEL_SIZE * CHAR_EMB          # 250-deep contraction per tap

# Tap grouping: one block-banded matmul covers GROUP_SIZE consecutive taps.
GROUP_SIZE = 6                                           # 3 on v5e
GROUP_DEPTH = KC + CHAR_EMB * (GROUP_SIZE - 1)           # 500
# Overlapping group starts covering all L_OUT taps with full-size groups only.
GROUP_STARTS = list(range(0, L_OUT - GROUP_SIZE + 1, GROUP_SIZE))
if GROUP_STARTS[-1] + GROUP_SIZE < L_OUT:
    GROUP_STARTS.append(L_OUT - GROUP_SIZE)              # -> [0, 6, 11]
NUM_GROUPS = len(GROUP_STARTS)


def _round_up(x, m):
    return (x + m - 1) // m * m


def cnn_kernel(x_ref, w_ref, b_ref, o_ref):
    """Fused Conv1d + ReLU + global max over the 17 conv positions.

    x_ref: (B_tile, M_WORD*CHAR_EMB)     bf16, channels-last, flattened per word
    w_ref: (GROUP_DEPTH, F*GROUP_SIZE)   bf16, block-banded grouped weight
    b_ref: (1, F)                        f32
    o_ref: (B_tile, F)                   f32 = max_t relu(conv_t + bias)
    """
    F = OUT_FEATURES
    m = None
    for t0 in GROUP_STARTS:              # 3 static groups, fully unrolled
        lo = t0 * CHAR_EMB
        # Ref-slice: load each window on demand (bounds live ranges; only
        # NUM_GROUPS unaligned lane slices per tile instead of 17).
        window = x_ref[:, lo:lo + GROUP_DEPTH]                  # (B_tile, 500) bf16
        # Column block j of w holds tap (t0+j)'s weights at row offset j*C, so
        # a single dot produces 6 conv positions at once (N=192 on the MXU).
        y = jnp.dot(window, w_ref[...],
                    preferred_element_type=jnp.float32)         # (B_tile, 192) f32
        m = y if m is None else jnp.maximum(m, y)
    # Epilogue (once per tile): reduce the 6 column blocks, then bias + ReLU.
    r = m[:, 0:F]
    for j in range(1, GROUP_SIZE):
        r = jnp.maximum(r, m[:, j * F:(j + 1) * F])
    o_ref[...] = jnp.maximum(r + b_ref[...], 0.0)


def _choose_tiling(B):
    """>=2 grid steps when B > 8 (v7x megacore / DMA overlap), padding <8 rows
    per tile, tiles up to ~1024 rows to amortize per-step overhead."""
    if B <= 8:
        num_tiles = 1
    else:
        num_tiles = max(2, pl.cdiv(B, 1024))
    b_tile = _round_up(pl.cdiv(B, num_tiles), 8)
    return num_tiles, b_tile, num_tiles * b_tile


@jax.jit
def cnn_forward(x_blc, weight_fck, bias_f):
    """Forward pass of the CNN module.

    x_blc:      (B, M_WORD, CHAR_EMB) channels-last activations (callers holding
                the PyTorch (B, C_in, L) layout transpose once on their side).
    weight_fck: (F, C_in, K) PyTorch Conv1d weight.
    bias_f:     (F,) Conv1d bias.
    Returns (B, F, 1) float32, matching MaxPool1d(ReLU(Conv1d(x))).
    """
    B, L, C = x_blc.shape
    F, _, K = weight_fck.shape
    assert (L, C, K) == (M_WORD, CHAR_EMB, KERNEL_SIZE)

    # bf16 matmul inputs, f32 accumulation (native MXU dtype on v6e/v7x).
    x_flat = x_blc.reshape(B, L * C).astype(jnp.bfloat16)

    # Per-tap weight: w_flat[k*C + c, f] = weight_fck[f, c, k].
    w_flat = jnp.transpose(weight_fck, (2, 1, 0)).reshape(K * C, F)
    # Block-banded grouped weight (500, 192): column block j = tap-j weights at
    # row offset j*C, zeros elsewhere.  Tiny (192 KB bf16), built once under jit.
    w_grp = jnp.zeros((GROUP_DEPTH, F * GROUP_SIZE), jnp.float32)
    for j in range(GROUP_SIZE):
        w_grp = w_grp.at[j * C:j * C + K * C, j * F:(j + 1) * F].set(w_flat)
    w_grp = w_grp.astype(jnp.bfloat16)
    b_1f = bias_f.reshape(1, F).astype(jnp.float32)

    num_tiles, b_tile, b_pad = _choose_tiling(B)
    if b_pad != B:
        x_flat = jnp.pad(x_flat, ((0, b_pad - B), (0, 0)))   # padded rows sliced off

    flops = 2 * b_pad * NUM_GROUPS * GROUP_DEPTH * F * GROUP_SIZE
    bytes_accessed = (x_flat.size * 2 + w_grp.size * 2 +
                      b_1f.size * 4 + b_pad * F * 4)

    out = pl.pallas_call(
        cnn_kernel,
        grid=(num_tiles,),
        in_specs=[
            # TODO(synk): on v5e, if the input DMA is still exposed in the
            # profile, add pipeline_mode=pl.Buffered(3) to this spec.
            pl.BlockSpec((b_tile, L * C), lambda i: (i, 0)),
            pl.BlockSpec((GROUP_DEPTH, F * GROUP_SIZE), lambda i: (0, 0)),  # resident
            pl.BlockSpec((1, F), lambda i: (0, 0)),                         # resident
        ],
        out_specs=pl.BlockSpec((b_tile, F), lambda i: (i, 0)),
        out_shape=jax.ShapeDtypeStruct((b_pad, F), jnp.float32),
        compiler_params=pltpu.CompilerParams(
            dimension_semantics=("parallel",)),
        cost_estimate=pl.CostEstimate(flops=flops, transcendentals=0,
                                      bytes_accessed=bytes_accessed),
    )(x_flat, w_grp, b_1f)

    return out[:B].reshape(B, F, 1)


def cnn_reference(x_ncl, weight_fck, bias_f):
    """Pure-JAX Conv1d + ReLU + MaxPool1d reference on bf16-rounded inputs
    (same quantization as the kernel's mixed-precision matmul)."""
    x = x_ncl.astype(jnp.bfloat16).astype(jnp.float32)
    w = weight_fck.astype(jnp.bfloat16).astype(jnp.float32)
    B, C, L = x.shape
    F, _, K = w.shape
    l_out = L - K + 1
    cols = jnp.stack([x[:, :, t:t + K] for t in range(l_out)], axis=1)  # (B,l_out,C,K)
    cols = cols.reshape(B, l_out, C * K)
    conv = jnp.einsum("blk,fk->bfl", cols, w.reshape(F, C * K)) + bias_f[None, :, None]
    relu = jnp.maximum(conv, 0.0)
    return jnp.max(relu, axis=2, keepdims=True)                         # (B, F, 1)


if __name__ == "__main__":
    key = jax.random.PRNGKey(0)
    k_x, k_w, k_b = jax.random.split(key, 3)

    B = 2
    # PyTorch-style (B, C_in, L) data + Conv1d parameter layout (F, C_in, K).
    x_ncl = jax.random.normal(k_x, (B, CHAR_EMB, M_WORD), dtype=jnp.float32)
    weight = 0.1 * jax.random.normal(
        k_w, (OUT_FEATURES, CHAR_EMB, KERNEL_SIZE), dtype=jnp.float32)
    bias = 0.1 * jax.random.normal(k_b, (OUT_FEATURES,), dtype=jnp.float32)

    # Kernel takes channels-last input; this single transpose is test-harness glue.
    x_blc = jnp.transpose(x_ncl, (0, 2, 1))

    out = cnn_forward(x_blc, weight, bias)
    jax.block_until_ready(out)

    ref = cnn_reference(x_ncl, weight, bias)
    assert out.shape == (B, OUT_FEATURES, 1), out.shape
    assert jnp.allclose(out, ref, atol=1e-3, rtol=1e-3), \
        float(jnp.max(jnp.abs(out - ref)))

    print("KERNEL_OK")
</pallas_src>

<mosaic_0001>
module attributes {stable_mosaic.version = 11 : i64} {
  func.func @cnn_kernel(%arg0: i32, %arg1: memref<8x1050xbf16, #tpu.memory_space<vmem>>, %arg2: memref<500x192xbf16, #tpu.memory_space<vmem>>, %arg3: memref<1x32xf32, #tpu.memory_space<vmem>>, %arg4: memref<8x32xf32, #tpu.memory_space<vmem>>) attributes {dimension_semantics = [#tpu.dimension_semantics<parallel>], iteration_bounds = array<i64: 1>, scalar_prefetch = 0 : i64, scratch_operands = 0 : i64, tpu.core_type = #tpu.core_type<tc>, window_params = [{transform_indices = @transform_0, window_bounds = array<i64: 8, 1050>}, {pipeline_mode = #tpu.pipeline_mode<synchronous>, transform_indices = @transform_1, window_bounds = array<i64: 500, 192>}, {pipeline_mode = #tpu.pipeline_mode<synchronous>, transform_indices = @transform_2, window_bounds = array<i64: 1, 32>}, {transform_indices = @transform_3, window_bounds = array<i64: 8, 32>}]} {
    %c0 = arith.constant 0 : index
    %c0_0 = arith.constant 0 : index
    %0 = vector.load %arg1[%c0, %c0_0] : memref<8x1050xbf16, #tpu.memory_space<vmem>>, vector<8x500xbf16>
    %c0_1 = arith.constant 0 : index
    %c0_2 = arith.constant 0 : index
    %1 = vector.load %arg2[%c0_1, %c0_2] : memref<500x192xbf16, #tpu.memory_space<vmem>>, vector<500x192xbf16>
    %cst = arith.constant dense<0.000000e+00> : vector<8x192xf32>
    %2 = tpu.matmul %0, %1, %cst {dimension_numbers = #tpu.dot_dimension_numbers<[1], [0], [0], [1], [0, 0, 1, 1], [], []>} : vector<8x500xbf16>, vector<500x192xbf16>, vector<8x192xf32> -> vector<8x192xf32>
    %c0_3 = arith.constant 0 : index
    %c300 = arith.constant 300 : index
    %3 = vector.load %arg1[%c0_3, %c300] : memref<8x1050xbf16, #tpu.memory_space<vmem>>, vector<8x500xbf16>
    %c0_4 = arith.constant 0 : index
    %c0_5 = arith.constant 0 : index
    %4 = vector.load %arg2[%c0_4, %c0_5] : memref<500x192xbf16, #tpu.memory_space<vmem>>, vector<500x192xbf16>
    %cst_6 = arith.constant dense<0.000000e+00> : vector<8x192xf32>
    %5 = tpu.matmul %3, %4, %cst_6 {dimension_numbers = #tpu.dot_dimension_numbers<[1], [0], [0], [1], [0, 0, 1, 1], [], []>} : vector<8x500xbf16>, vector<500x192xbf16>, vector<8x192xf32> -> vector<8x192xf32>
    %6 = arith.maximumf %2, %5 : vector<8x192xf32>
    %c0_7 = arith.constant 0 : index
    %c550 = arith.constant 550 : index
    %7 = vector.load %arg1[%c0_7, %c550] : memref<8x1050xbf16, #tpu.memory_space<vmem>>, vector<8x500xbf16>
    %c0_8 = arith.constant 0 : index
    %c0_9 = arith.constant 0 : index
    %8 = vector.load %arg2[%c0_8, %c0_9] : memref<500x192xbf16, #tpu.memory_space<vmem>>, vector<500x192xbf16>
    %cst_10 = arith.constant dense<0.000000e+00> : vector<8x192xf32>
    %9 = tpu.matmul %7, %8, %cst_10 {dimension_numbers = #tpu.dot_dimension_numbers<[1], [0], [0], [1], [0, 0, 1, 1], [], []>} : vector<8x500xbf16>, vector<500x192xbf16>, vector<8x192xf32> -> vector<8x192xf32>
    %10 = arith.maximumf %6, %9 : vector<8x192xf32>
    %11 = vector.extract_strided_slice %10 {offsets = [0, 0], sizes = [8, 32], strides = [1, 1]} : vector<8x192xf32> to vector<8x32xf32>
    %12 = vector.extract_strided_slice %10 {offsets = [0, 32], sizes = [8, 32], strides = [1, 1]} : vector<8x192xf32> to vector<8x32xf32>
    %13 = arith.maximumf %11, %12 : vector<8x32xf32>
    %14 = vector.extract_strided_slice %10 {offsets = [0, 64], sizes = [8, 32], strides = [1, 1]} : vector<8x192xf32> to vector<8x32xf32>
    %15 = arith.maximumf %13, %14 : vector<8x32xf32>
    %16 = vector.extract_strided_slice %10 {offsets = [0, 96], sizes = [8, 32], strides = [1, 1]} : vector<8x192xf32> to vector<8x32xf32>
    %17 = arith.maximumf %15, %16 : vector<8x32xf32>
    %18 = vector.extract_strided_slice %10 {offsets = [0, 128], sizes = [8, 32], strides = [1, 1]} : vector<8x192xf32> to vector<8x32xf32>
    %19 = arith.maximumf %17, %18 : vector<8x32xf32>
    %20 = vector.extract_strided_slice %10 {offsets = [0, 160], sizes = [8, 32], strides = [1, 1]} : vector<8x192xf32> to vector<8x32xf32>
    %21 = arith.maximumf %19, %20 : vector<8x32xf32>
    %c0_11 = arith.constant 0 : index
    %c0_12 = arith.constant 0 : index
    %22 = vector.load %arg3[%c0_11, %c0_12] : memref<1x32xf32, #tpu.memory_space<vmem>>, vector<1x32xf32>
    %23 = vector.broadcast %22 : vector<1x32xf32> to vector<8x32xf32>
    %24 = arith.addf %21, %23 : vector<8x32xf32>
    %cst_13 = arith.constant 0.000000e+00 : f32
    %25 = vector.broadcast %cst_13 : f32 to vector<8x32xf32>
    %26 = arith.maximumf %24, %25 : vector<8x32xf32>
    %c0_14 = arith.constant 0 : index
    %c0_15 = arith.constant 0 : index
    %27 = vector.load %arg4[%c0_14, %c0_15] : memref<8x32xf32, #tpu.memory_space<vmem>>, vector<8x32xf32>
    tpu.vector_store %arg4[%c0_14, %c0_15], %26 {strides = array<i32>} : memref<8x32xf32, #tpu.memory_space<vmem>>, vector<8x32xf32>,
    return
  }
  func.func @transform_0(%arg0: i32) -> (i32, i32) {
    %c0_i32 = arith.constant 0 : i32
    %c0_i32_0 = arith.constant 0 : i32
    return %arg0, %c0_i32 : i32, i32
  }
  func.func @transform_1(%arg0: i32) -> (i32, i32) {
    %c0_i32 = arith.constant 0 : i32
    %c0_i32_0 = arith.constant 0 : i32
    %c0_i32_1 = arith.constant 0 : i32
    return %c0_i32, %c0_i32_0 : i32, i32
  }
  func.func @transform_2(%arg0: i32) -> (i32, i32) {
    %c0_i32 = arith.constant 0 : i32
    %c0_i32_0 = arith.constant 0 : i32
    %c0_i32_1 = arith.constant 0 : i32
    return %c0_i32, %c0_i32_0 : i32, i32
  }
  func.func @transform_3(%arg0: i32) -> (i32, i32) {
    %c0_i32 = arith.constant 0 : i32
    %c0_i32_0 = arith.constant 0 : i32
    return %arg0, %c0_i32 : i32, i32
  }
}

</mosaic_0001>

<bundles_post_ra>
// kernel: cnn_forward.1
= control target key start
LH: loop header
LB: loop body
LE: loop exit
PB: predicated region body
PF: predicated region fallthrough
CT: control target
= control target key end

     0   :  { %vm407_vm0 = vcmask 949248   ;;  %s971_s26 = smov 84   ;;  %s972_s5 = smov 90   ;;  %vm411_vm1 = vcmask 1041408   ;;  %vm526_vm2 = vcmask 687104   ;;  %vm647_vm3 = vcmask 736256   ;;  %s1557_s1 = inlined_call_operand.vmem [shape: bf16[500,192], index: 1, kind: input, shape index: {}]   ;;  %s1558_s0 = inlined_call_operand.vmem [shape: bf16[8,1050], index: 0, kind: input, shape index: {}]   ;;  %s1559_s2 = inlined_call_operand.vmem [shape: f32[1,32], index: 2, kind: input, shape index: {}]   ;;  %s1560_s3 = inlined_call_operand.vmem [shape: f32[8,32], index: 3, kind: output, shape index: {}]  }
   0x1   :  { %v999_v0 = vld [vmem:[%s1557_s1 + $0x74] ss:$8 sps:$4 sm:$0xff]   ;;  %v500_v2 = vld [vmem:[%s1558_s0 + $0x8] sm:$0xff]  ;;  %v1013_v3 = vld [vmem:[%s1557_s1 + $0x70] ss:$8 sps:$4 sm:$0xff]   ;;  %s974_s18 = smov 96  }
   0x2   :  { %v1004_v1 = vld [vmem:[%s1557_s1 + $0x174] ss:$8 sps:$4 sm:$0xff]   ;;  %418 = vmatprep.subr.bf16.mxu0 %v999_v0  ;;  %v1018_v4 = vld [vmem:[%s1557_s1 + $0x170] ss:$8 sps:$4 sm:$0xff]   ;;  %v847_v5 = vcombine.high %v500_v2, %v500_v2  ;;  %v1024_v6 = vld [vmem:[%s1557_s1 + $0x64] ss:$8 sps:$4 sm:$0xff]   ;;  %v1070_v17 = vcombine.low %v500_v2, %v500_v2 }
   0x3   :  { %459 = vmatprep.subr.bf16.mxu1 %v1004_v1  ;;  %419 = vmatpush1.bf16.msra.mxu0 %v1013_v3  ;;  %v1031_v7 = vld [vmem:[%s1557_s1 + $0x164] ss:$8 sps:$4 sm:$0xff]   ;;  %v501_v8 = vld [vmem:[%s1558_s0 + $0x10] sm:$0xff]  ;;  %v1040_v9 = vld [vmem:[%s1557_s1 + $0x60] ss:$8 sps:$4 sm:$0xff]   ;;  %s975_s19 = smov 32  }
   0x4   :  { %460 = vmatpush1.bf16.msra.mxu1 %v1018_v4  ;;  %518 = vrot.lane.b32.xlu0 %v847_v5, %s971_s26  ;;  %v1045_v10 = vld [vmem:[%s1557_s1 + $0x160] ss:$8 sps:$4 sm:$0xff]   ;;  %v849_v11 = vcombine.high %v501_v8, %v501_v8  ;;  %v1048_v12 = vcombine.low %v501_v8, %v501_v8  ;;  %v1053_v13 = vld [vmem:[%s1557_s1 + $0x54] ss:$8 sps:$4 sm:$0xff]   ;;  %v886_v15 = vld [vmem:[%s1558_s0 + $0x18] ss:$0 sps:$4 sm:$0xff]  }
   0x5   :  { %420 = vmatprep.subr.bf16.mxu0 %v1024_v6  ;;  %461 = vmatprep.subr.bf16.mxu1 %v1031_v7  ;;  %v1059_v14 = vld [vmem:[%s1557_s1 + $0x154] ss:$8 sps:$4 sm:$0xff]   ;;  %v1068_v16 = vld [vmem:[%s1557_s1 + $0x50] ss:$8 sps:$4 sm:$0xff]   ;;  %v1084_v19 = vld [vmem:[%s1557_s1 + $0x44] ss:$8 sps:$4 sm:$0xff]  }
   0x6   :  { %845 = vmatprep.mubr.msk.bf16.mxu1 %vm407_vm0, %v847_v5  ;;  %522 = vrot.lane.b32.xlu1 %v849_v11, %s971_s26  ;;  %v1077_v18 = vld [vmem:[%s1557_s1 + $0x150] ss:$8 sps:$4 sm:$0xff]   ;;  %v1089_v20 = vld [vmem:[%s1557_s1 + $0x144] ss:$8 sps:$4 sm:$0xff]   ;;  %v1094_v21 = vld [vmem:[%s1557_s1 + $0x40] ss:$8 sps:$4 sm:$0xff]  }
   0x7   :  { %421 = vmatpush1.bf16.msra.mxu0 %v1040_v9  ;;  %v1100_v22 = vld [vmem:[%s1557_s1 + $0x140] ss:$8 sps:$4 sm:$0xff]   ;;  %v1107_v23 = vld [vmem:[%s1557_s1 + $0x34] ss:$8 sps:$4 sm:$0xff]   ;;  %v1120_v25 = vld [vmem:[%s1557_s1 + $0x30] ss:$8 sps:$4 sm:$0xff]  }
   0x8   :  { %520 = vrot.lane.b32.xlu0 %v1048_v12, %s971_s26  ;;  %462 = vmatpush1.bf16.msra.mxu1 %v1045_v10  ;;  %v1114_v24 = vld [vmem:[%s1557_s1 + $0x134] ss:$8 sps:$4 sm:$0xff]   ;;  %v1125_v26 = vld [vmem:[%s1557_s1 + $0x130] ss:$8 sps:$4 sm:$0xff]   ;;  %v1133_v27 = vld [vmem:[%s1557_s1 + $0x24] ss:$8 sps:$4 sm:$0xff]  }
   0x9   :  { %422 = vmatprep.subr.bf16.mxu0 %v1053_v13  ;;  %463 = vmatprep.subr.bf16.mxu1 %v1059_v14  ;;  %v1139_v28 = vld [vmem:[%s1557_s1 + $0x124] ss:$8 sps:$4 sm:$0xff]   ;;  %v1144_v29 = vld [vmem:[%s1557_s1 + $0x20] ss:$8 sps:$4 sm:$0xff]   ;;  %v1157_v31 = vld [vmem:[%s1557_s1 + $0x14] ss:$8 sps:$4 sm:$0xff]  }
   0xa   :  { %524 = vrot.lane.b32.xlu1 %v886_v15, %s971_s26  ;;  %v1150_v30 = vld [vmem:[%s1557_s1 + $0x120] ss:$8 sps:$4 sm:$0xff]   ;;  %v1163_v32 = vld [vmem:[%s1557_s1 + $0x114] ss:$8 sps:$4 sm:$0xff]   ;;  %v1168_v33 = vld [vmem:[%s1557_s1 + $0x10] ss:$8 sps:$4 sm:$0xff]  }
   0xb   :  { %423 = vmatpush1.bf16.msra.mxu0 %v1068_v16  ;;  %v1174_v34 = vld [vmem:[%s1557_s1 + $0x110] ss:$8 sps:$4 sm:$0xff]   ;;  %v1181_v35 = vld [vmem:[%s1557_s1 + $0x4] ss:$8 sps:$4 sm:$0xff]   ;;  %v1196_v38 = vld [vmem:[%s1557_s1] ss:$8 sps:$4 sm:$0xff]  }
   0xc   :  { %516 = vrot.lane.b32.xlu0 %v1070_v17, %s971_s26  ;;  %464 = vmatpush1.bf16.msra.mxu1 %v1077_v18  ;;  %v1187_v36 = vld [vmem:[%s1557_s1 + $0x104] ss:$8 sps:$4 sm:$0xff]   ;;  %v78_v37 = vld [vmem:[%s1557_s1 + $0x1f0] sm:$0x33]  ;;  %v1203_v39 = vld [vmem:[%s1557_s1 + $0x100] ss:$8 sps:$4 sm:$0xff]  }
   0xd   :  { %424 = vmatprep.subr.bf16.mxu0 %v1084_v19  ;;  %465 = vmatprep.subr.bf16.mxu1 %v1089_v20  ;;  %v1208_v40 = vld [vmem:[%s1557_s1 + $0xf4] ss:$8 sps:$4 sm:$0xff]   ;;  %v1211_v41 = vcombine.high %v78_v37, %v78_v37  ;;  %v842_v42 = vcombine.low %v78_v37, %v78_v37  ;;  %v1217_v43 = vld [vmem:[%s1557_s1 + $0xf0] ss:$8 sps:$4 sm:$0xff]   ;;  %v1224_v44 = vld [vmem:[%s1557_s1 + $0xe4] ss:$8 sps:$4 sm:$0xff]  }
   0xe   :  { %639 = vrot.lane.b32.xlu1 %v849_v11, %s972_s5  ;;  %v1234_v46 = vld [vmem:[%s1557_s1 + $0x1e4] ss:$8 sps:$4 sm:$0xff]   ;;  %v1240_v47 = vld [vmem:[%s1557_s1 + $0xe0] ss:$8 sps:$4 sm:$0xff]   ;;  %v1252_v49 = vld [vmem:[%s1557_s1 + $0xd4] ss:$8 sps:$4 sm:$0xff]  }
   0xf   :  { %425 = vmatpush1.bf16.msra.mxu0 %v1094_v21  ;;  %v1229_v45 = vsel %vm411_vm1, %v842_v42, 0  ;;  %v1247_v48 = vld [vmem:[%s1557_s1 + $0x1e0] ss:$8 sps:$4 sm:$0xff]   ;;  %v1258_v50 = vld [vmem:[%s1557_s1 + $0x1d4] ss:$8 sps:$4 sm:$0xff]   ;;  %vm770_vm4 = vcmask 261120  }
  0x10   :  { %466 = vmatpush1.bf16.msra.mxu1 %v1100_v22  ;;  %426 = vmatprep.subr.bf16.mxu0 %v1107_v23  ;;  %v1263_v51 = vld [vmem:[%s1557_s1 + $0xd0] ss:$8 sps:$4 sm:$0xff]   ;;  %v1276_v53 = vld [vmem:[%s1557_s1 + $0xc4] ss:$8 sps:$4 sm:$0xff]   ;;  %v1294_v57 = vld [vmem:[%s1557_s1 + $0xc0] ss:$8 sps:$4 sm:$0xff]  }
  0x11   :  { %467 = vmatprep.subr.bf16.mxu1 %v1114_v24  ;;  %v1269_v52 = vld [vmem:[%s1557_s1 + $0x1d0] ss:$8 sps:$4 sm:$0xff]   ;;  %v1282_v54 = vld [vmem:[%s1557_s1 + $0x1c4] ss:$8 sps:$4 sm:$0xff]   ;;  %v1301_v61 = vld [vmem:[%s1557_s1 + $0x1c0] ss:$8 sps:$4 sm:$0xff]  }
  0x12   :  { %v14_v55 = vld [vmem:[%s1558_s0] sm:$0xff]  ;;  %v622_v56 = vld [vmem:[%s1558_s0 + $0x18] sm:$0xff]  ;;  %1574 = vst [vmem:[#allocation2_spill] sm:$0xff] %v1301_v61 }
  0x13   :  { %427 = vmatpush1.bf16.msra.mxu0 %v1120_v25  ;;  %v777_v58 = vcombine.high %v14_v55, %v14_v55  ;;  %v856_v59 = vcombine.high %v622_v56, %v622_v56  ;;  %v855_v60 = vcombine.low %v622_v56, %v622_v56  ;;  %v1306_v62 = vld [vmem:[%s1557_s1 + $0xb4] ss:$8 sps:$4 sm:$0xff]   ;;  %v970_v2 = vld [vmem:[%s1558_s0 + $0x20] ss:$0 sps:$4 sm:$0xff]   ;;  %v1323_v5 = vld [vmem:[%s1557_s1 + $0xb0] ss:$8 sps:$4 sm:$0xff]  }
  0x14   :  { %468 = vmatpush1.bf16.msra.mxu1 %v1125_v26  ;;  %428 = vmatprep.subr.bf16.mxu0 %v1133_v27  ;;  %1575 = vst [vmem:[#allocation3_spill] sm:$0xff] %v1306_v62  ;;  %v1312_v63 = vld [vmem:[%s1557_s1 + $0x1b4] ss:$8 sps:$4 sm:$0xff]   ;;  %v1330_v8 = vld [vmem:[%s1557_s1 + $0x1b0] ss:$8 sps:$4 sm:$0xff]  }
  0x15   :  { %469 = vmatprep.subr.bf16.mxu1 %v1139_v28  ;;  %1576 = vst [vmem:[#allocation4_spill] sm:$0xff] %v1312_v63  ;;  %450 = vmatprep.mubr.bf16.mxu0 %v777_v58  ;;  %1577 = vst [vmem:[#allocation5_spill] sm:$0xff] %v1330_v8  ;;  %v1335_v11 = vld [vmem:[%s1557_s1 + $0xa4] ss:$8 sps:$4 sm:$0xff]   ;;  %v1350_v37 = vld [vmem:[%s1557_s1 + $0xa0] ss:$8 sps:$4 sm:$0xff]  }
  0x16   :  { %643 = vrot.lane.b32.xlu1 %v856_v59, %s972_s5  ;;  %641 = vrot.lane.b32.xlu0 %v855_v60, %s972_s5  ;;  %v1341_v15 = vld [vmem:[%s1557_s1 + $0x1a4] ss:$8 sps:$4 sm:$0xff]   ;;  %1579 = vst [vmem:[#allocation7_spill] sm:$0xff] %v1350_v37  ;;  %v1357_v42 = vld [vmem:[%s1557_s1 + $0x1a0] ss:$8 sps:$4 sm:$0xff]  }
  0x17   :  { %429 = vmatpush1.bf16.msra.mxu0 %v1144_v29  ;;  %1578 = vst [vmem:[#allocation6_spill] sm:$0xff] %v1341_v15  ;;  %1580 = vst [vmem:[#allocation8_spill] sm:$0xff] %v1357_v42  ;;  %v1368_v56 = vld [vmem:[%s1557_s1 + $0x194] ss:$8 sps:$4 sm:$0xff]   ;;  %v1374_v58 = vld [vmem:[%s1557_s1 + $0x90] ss:$8 sps:$4 sm:$0xff]  }
  0x18   :  { %470 = vmatpush1.bf16.msra.mxu1 %v1150_v30  ;;  %430 = vmatprep.subr.bf16.mxu0 %v1157_v31  ;;  %1582 = vst [vmem:[#allocation10_spill] sm:$0xff] %v1368_v56  ;;  %v1381_v59 = vld [vmem:[%s1557_s1 + $0x190] ss:$8 sps:$4 sm:$0xff]   ;;  %v1386_v60 = vld [vmem:[%s1557_s1 + $0x84] ss:$8 sps:$4 sm:$0xff]  }
  0x19   :  { %471 = vmatprep.subr.bf16.mxu1 %v1163_v32  ;;  %1583 = vst [vmem:[#allocation11_spill] sm:$0xff] %v1381_v59 }
  0x1a   :  { %637 = vrot.lane.b32.xlu1 %v1048_v12, %s972_s5  ;;  %645 = vrot.lane.b32.xlu0 %v970_v2, %s972_s5  ;;  %v1362_v12 = vld [vmem:[%s1557_s1 + $0x94] ss:$8 sps:$4 sm:$0xff]   ;;  %v1392_v2 = vld [vmem:[%s1557_s1 + $0x184] ss:$8 sps:$4 sm:$0xff]  }
  0x1b   :  { %431 = vmatpush1.bf16.msra.mxu0 %v1168_v33  ;;  %1581 = vst [vmem:[#allocation9_spill] sm:$0xff] %v1362_v12 }
  0x1c   :  { %472 = vmatpush1.bf16.msra.mxu1 %v1174_v34  ;;  %432 = vmatprep.subr.bf16.mxu0 %v1181_v35 }
  0x1d   :  { %473 = vmatprep.subr.bf16.mxu1 %v1187_v36 }
  0x1f   :  { %433 = vmatpush1.bf16.msra.mxu0 %v1196_v38 }
  0x20   :  { %474 = vmatpush1.bf16.msra.mxu1 %v1203_v39  ;;  %434 = vmatprep.subr.bf16.mxu0 %v1208_v40 }
  0x21   :  { %844 = vmatprep.subr.msk.bf16.mxu1 %vm411_vm1, %v1211_v41 }
  0x23   :  { %435 = vmatpush2.bf16.msra.mxu0 %v1217_v43 }
  0x24   :  { %476 = vmatpush2.bf16.msra.mxu1 %v1229_v45  ;;  %436 = vmatprep.subr.bf16.mxu0 %v1224_v44 }
  0x25   :  { %477 = vmatprep.subr.bf16.mxu1 %v1234_v46 }
  0x27   :  { %437 = vmatpush2.bf16.msra.mxu0 %v1240_v47 }
  0x28   :  { %478 = vmatpush2.bf16.msra.mxu1 %v1247_v48  ;;  %438 = vmatprep.subr.bf16.mxu0 %v1252_v49 }
  0x29   :  { %479 = vmatprep.subr.bf16.mxu1 %v1258_v50 }
  0x2b   :  { %439 = vmatpush2.bf16.msra.mxu0 %v1263_v51 }
  0x2c   :  { %480 = vmatpush2.bf16.msra.mxu1 %v1269_v52  ;;  %440 = vmatprep.subr.bf16.mxu0 %v1276_v53 }
  0x2d   :  { %481 = vmatprep.subr.bf16.mxu1 %v1282_v54 }
  0x2f   :  { %441 = vmatpush2.bf16.msra.mxu0 %v1294_v57 }
  0x30   :  { %482 = vmatpush2.bf16.msra.mxu1 %v1301_v61  ;;  %442 = vmatprep.subr.bf16.mxu0 %v1306_v62 }
  0x31   :  { %483 = vmatprep.subr.bf16.mxu1 %v1312_v63 }
  0x33   :  { %443 = vmatpush2.bf16.msra.mxu0 %v1323_v5 }
  0x34   :  { %484 = vmatpush2.bf16.msra.mxu1 %v1330_v8  ;;  %444 = vmatprep.subr.bf16.mxu0 %v1335_v11 }
  0x35   :  { %485 = vmatprep.subr.bf16.mxu1 %v1341_v15 }
  0x37   :  { %445 = vmatpush2.bf16.msra.mxu0 %v1350_v37 }
  0x38   :  { %486 = vmatpush2.bf16.msra.mxu1 %v1357_v42  ;;  %446 = vmatprep.subr.bf16.mxu0 %v1362_v12  ;;  %v1398_v12 = vld [vmem:[%s1557_s1 + $0x80] ss:$8 sps:$4 sm:$0xff]   ;;  %v776_v42 = vcombine.low %v14_v55, %v14_v55  ;;  %v1584_v55 = vld [vmem:[#allocation8_spill] sm:$0xff] }
  0x39   :  { %487 = vmatprep.subr.bf16.mxu1 %v1368_v56  ;;  %v1405_v56 = vld [vmem:[%s1557_s1 + $0x180] ss:$8 sps:$4 sm:$0xff]   ;;  %s973_s1 = smov 64  }
  0x3b   :  { %447 = vmatpush2.bf16.msra.mxu0 %v1374_v58 }
  0x3c   :  { %488 = vmatpush2.bf16.msra.mxu1 %v1381_v59  ;;  %448 = vmatprep.subr.bf16.mxu0 %v1386_v60 }
  0x3d   :  { %489 = vmatprep.subr.bf16.mxu1 %v1392_v2 }
  0x3f   :  { %449 = vmatpush2.bf16.msra.mxu0 %v1398_v12 }
  0x40   :  { %490 = vmatpush2.bf16.msra.mxu1 %v1405_v56  ;;  %537 = vmatprep.subr.bf16.mxu0 %v999_v0 }
  0x41   :  { %578 = vmatprep.subr.bf16.mxu1 %v1004_v1 }
  0x42   :  { %451 = vmatmul.mubr.bf16.vlgmr.msra.gmra.mxu0 %v776_v42  ;;  %v1585_v42 = vld [vmem:[#allocation9_spill] sm:$0xff] }
  0x43   :  { %492 = vmatmul.mubr.bf16.vlgmr.msra.gmra.mxu1 %v1070_v17  ;;  %538 = vmatpush1.bf16.msra.mxu0 %v1013_v3 }
  0x44   :  { %579 = vmatpush1.bf16.msra.mxu1 %v1018_v4  ;;  %539 = vmatprep.subr.bf16.mxu0 %v1024_v6 }
  0x45   :  { %580 = vmatprep.subr.bf16.mxu1 %v1031_v7 }
  0x47   :  { %540 = vmatpush1.bf16.msra.mxu0 %v1040_v9 }
  0x48   :  { %581 = vmatpush1.bf16.msra.mxu1 %v1045_v10  ;;  %541 = vmatprep.subr.bf16.mxu0 %v1053_v13 }
  0x49   :  { %582 = vmatprep.subr.bf16.mxu1 %v1059_v14 }
  0x4b   :  { %542 = vmatpush1.bf16.msra.mxu0 %v1068_v16 }
  0x4c   :  { %583 = vmatpush1.bf16.msra.mxu1 %v1077_v18  ;;  %543 = vmatprep.subr.bf16.mxu0 %v1084_v19 }
  0x4d   :  { %584 = vmatprep.subr.bf16.mxu1 %v1089_v20 }
  0x4f   :  { %544 = vmatpush1.bf16.msra.mxu0 %v1094_v21 }
  0x50   :  { %585 = vmatpush1.bf16.msra.mxu1 %v1100_v22  ;;  %545 = vmatprep.subr.bf16.mxu0 %v1107_v23 }
  0x51   :  { %586 = vmatprep.subr.bf16.mxu1 %v1114_v24 }
  0x53   :  { %546 = vmatpush1.bf16.msra.mxu0 %v1120_v25 }
  0x54   :  { %587 = vmatpush1.bf16.msra.mxu1 %v1125_v26  ;;  %547 = vmatprep.subr.bf16.mxu0 %v1133_v27 }
  0x55   :  { %588 = vmatprep.subr.bf16.mxu1 %v1139_v28 }
  0x57   :  { %548 = vmatpush1.bf16.msra.mxu0 %v1144_v29 }
  0x58   :  { %589 = vmatpush1.bf16.msra.mxu1 %v1150_v30  ;;  %549 = vmatprep.subr.bf16.mxu0 %v1157_v31 }
  0x59   :  { %590 = vmatprep.subr.bf16.mxu1 %v1163_v32 }
  0x5b   :  { %550 = vmatpush1.bf16.msra.mxu0 %v1168_v33 }
  0x5c   :  { %591 = vmatpush1.bf16.msra.mxu1 %v1174_v34  ;;  %551 = vmatprep.subr.bf16.mxu0 %v1181_v35 }
  0x5d   :  { %592 = vmatprep.subr.bf16.mxu1 %v1187_v36 }
  0x5f   :  { %552 = vmatpush1.bf16.msra.mxu0 %v1196_v38 }
  0x60   :  { %593 = vmatpush1.bf16.msra.mxu1 %v1203_v39  ;;  %553 = vmatprep.subr.bf16.mxu0 %v1208_v40 }
  0x61   :  { %851 = vmatprep.subr.msk.bf16.mxu1 %vm411_vm1, %v1211_v41 }
  0x63   :  { %554 = vmatpush2.bf16.msra.mxu0 %v1217_v43 }
  0x64   :  { %595 = vmatpush2.bf16.msra.mxu1 %v1229_v45  ;;  %555 = vmatprep.subr.bf16.mxu0 %v1224_v44 }
  0x65   :  { %596 = vmatprep.subr.bf16.mxu1 %v1234_v46 }
  0x67   :  { %556 = vmatpush2.bf16.msra.mxu0 %v1240_v47 }
  0x68   :  { %597 = vmatpush2.bf16.msra.mxu1 %v1247_v48  ;;  %557 = vmatprep.subr.bf16.mxu0 %v1252_v49 }
  0x69   :  { %598 = vmatprep.subr.bf16.mxu1 %v1258_v50 }
  0x6b   :  { %558 = vmatpush2.bf16.msra.mxu0 %v1263_v51 }
  0x6c   :  { %599 = vmatpush2.bf16.msra.mxu1 %v1269_v52  ;;  %559 = vmatprep.subr.bf16.mxu0 %v1276_v53 }
  0x6d   :  { %600 = vmatprep.subr.bf16.mxu1 %v1282_v54 }
  0x6f   :  { %560 = vmatpush2.bf16.msra.mxu0 %v1294_v57 }
  0x70   :  { %601 = vmatpush2.bf16.msra.mxu1 %v1301_v61  ;;  %561 = vmatprep.subr.bf16.mxu0 %v1306_v62  ;;  %v1586_v62 = vld [vmem:[#allocation10_spill] sm:$0xff] }
  0x71   :  { %602 = vmatprep.subr.bf16.mxu1 %v1312_v63 }
  0x73   :  { %562 = vmatpush2.bf16.msra.mxu0 %v1323_v5 }
  0x74   :  { %603 = vmatpush2.bf16.msra.mxu1 %v1330_v8  ;;  %563 = vmatprep.subr.bf16.mxu0 %v1335_v11 }
  0x75   :  { %604 = vmatprep.subr.bf16.mxu1 %v1341_v15 }
  0x76   :  { %v519_v17 = vpop.permute.xlu0 %518 }
  0x77   :  { %564 = vmatpush2.bf16.msra.mxu0 %v1350_v37 }
  0x78   :  { %605 = vmatpush2.bf16.msra.mxu1 %v1584_v55  ;;  %565 = vmatprep.subr.bf16.mxu0 %v1585_v42  ;;  %v523_v61 = vpop.permute.xlu1 %522 }
  0x79   :  { %606 = vmatprep.subr.bf16.mxu1 %v1586_v62 }
  0x7a   :  { %v521_v63 = vpop.permute.xlu0 %520 }
  0x7b   :  { %566 = vmatpush2.bf16.msra.mxu0 %v1374_v58  ;;  %v528_v8 = vsel %vm526_vm2, %v519_v17, %v521_v63 }
  0x7c   :  { %569 = vmatprep.mubr.bf16.mxu0 %v528_v8  ;;  %607 = vmatpush2.bf16.msra.mxu1 %v1381_v59  ;;  %v525_v15 = vpop.permute.xlu1 %524  ;;  %v529_v59 = vsel %vm526_vm2, %v521_v63, %v523_v61 }
  0x7d   :  { %567 = vmatprep.subr.bf16.mxu0 %v1386_v60  ;;  %608 = vmatprep.subr.bf16.mxu1 %v1392_v2  ;;  %v530_v55 = vsel %vm526_vm2, %v523_v61, %v525_v15 }
  0x7e   :  { %v517_v37 = vpop.permute.xlu0 %516  ;;  %852 = vmatprep.mubr.msk.bf16.mxu1 %vm407_vm0, %v530_v55 }
  0x7f   :  { %568 = vmatpush2.bf16.msra.mxu0 %v1398_v12  ;;  %v527_v8 = vsel %vm526_vm2, %v517_v37, %v519_v17 }
  0x80   :  { %609 = vmatpush2.bf16.msra.mxu1 %v1405_v56  ;;  %658 = vmatprep.subr.bf16.mxu0 %v999_v0  ;;  %v640_v0 = vpop.permute.xlu1 %639 }
  0x81   :  { %699 = vmatprep.subr.bf16.mxu1 %v1004_v1 }
  0x82   :  { %570 = vmatmul.mubr.bf16.vlgmr.msra.gmra.mxu0 %v527_v8 }
  0x83   :  { %611 = vmatmul.mubr.bf16.vlgmr.msra.gmra.mxu1 %v529_v59  ;;  %659 = vmatpush1.bf16.msra.mxu0 %v1013_v3 }
  0x84   :  { %700 = vmatpush1.bf16.msra.mxu1 %v1018_v4  ;;  %660 = vmatprep.subr.bf16.mxu0 %v1024_v6 }
  0x85   :  { %701 = vmatprep.subr.bf16.mxu1 %v1031_v7 }
  0x87   :  { %661 = vmatpush1.bf16.msra.mxu0 %v1040_v9  ;;  %v1587_v9 = vld [vmem:[#allocation2_spill] sm:$0xff] }
  0x88   :  { %702 = vmatpush1.bf16.msra.mxu1 %v1045_v10  ;;  %662 = vmatprep.subr.bf16.mxu0 %v1053_v13  ;;  %v642_v1 = vpop.permute.xlu0 %641  ;;  %v644_v4 = vpop.permute.xlu1 %643  ;;  %v1588_v10 = vld [vmem:[#allocation3_spill] sm:$0xff]  ;;  %v1589_v13 = vld [vmem:[#allocation4_spill] sm:$0xff] }
  0x89   :  { %703 = vmatprep.subr.bf16.mxu1 %v1059_v14  ;;  %v649_v3 = vsel %vm647_vm3, %v640_v0, %v642_v1  ;;  %v1590_v14 = vld [vmem:[#allocation5_spill] sm:$0xff] }
  0x8a   :  { %690 = vmatprep.mubr.bf16.mxu0 %v649_v3 }
  0x8b   :  { %663 = vmatpush1.bf16.msra.mxu0 %v1068_v16  ;;  %v1591_v16 = vld [vmem:[#allocation6_spill] sm:$0xff] }
  0x8c   :  { %704 = vmatpush1.bf16.msra.mxu1 %v1077_v18  ;;  %664 = vmatprep.subr.bf16.mxu0 %v1084_v19  ;;  %v646_v6 = vpop.permute.xlu0 %645  ;;  %v1592_v18 = vld [vmem:[#allocation7_spill] sm:$0xff]  ;;  %v1593_v19 = vld [vmem:[#allocation8_spill] sm:$0xff] }
  0x8d   :  { %705 = vmatprep.subr.bf16.mxu1 %v1089_v20  ;;  %v651_v7 = vsel %vm647_vm3, %v644_v4, %v646_v6  ;;  %v1594_v20 = vld [vmem:[#allocation11_spill] sm:$0xff] }
  0x8e   :  { %859 = vmatprep.mubr.msk.bf16.mxu1 %vm407_vm0, %v651_v7 }
  0x8f   :  { %665 = vmatpush1.bf16.msra.mxu0 %v1094_v21  ;;  %v638_v21 = vpop.permute.xlu1 %637 }
  0x90   :  { %706 = vmatpush1.bf16.msra.mxu1 %v1100_v22  ;;  %666 = vmatprep.subr.bf16.mxu0 %v1107_v23  ;;  %v648_v22 = vsel %vm647_vm3, %v638_v21, %v640_v0  ;;  %v650_v23 = vsel %vm647_vm3, %v642_v1, %v644_v4 }
  0x91   :  { %707 = vmatprep.subr.bf16.mxu1 %v1114_v24 }
  0x93   :  { %667 = vmatpush1.bf16.msra.mxu0 %v1120_v25 }
  0x94   :  { %708 = vmatpush1.bf16.msra.mxu1 %v1125_v26  ;;  %668 = vmatprep.subr.bf16.mxu0 %v1133_v27 }
  0x95   :  { %709 = vmatprep.subr.bf16.mxu1 %v1139_v28 }
  0x97   :  { %669 = vmatpush1.bf16.msra.mxu0 %v1144_v29 }
  0x98   :  { %710 = vmatpush1.bf16.msra.mxu1 %v1150_v30  ;;  %670 = vmatprep.subr.bf16.mxu0 %v1157_v31 }
  0x99   :  { %711 = vmatprep.subr.bf16.mxu1 %v1163_v32 }
  0x9b   :  { %671 = vmatpush1.bf16.msra.mxu0 %v1168_v33 }
  0x9c   :  { %712 = vmatpush1.bf16.msra.mxu1 %v1174_v34  ;;  %672 = vmatprep.subr.bf16.mxu0 %v1181_v35 }
  0x9d   :  { %713 = vmatprep.subr.bf16.mxu1 %v1187_v36 }
  0x9f   :  { %673 = vmatpush1.bf16.msra.mxu0 %v1196_v38 }
  0xa0   :  { %714 = vmatpush1.bf16.msra.mxu1 %v1203_v39  ;;  %674 = vmatprep.subr.bf16.mxu0 %v1208_v40 }
  0xa1   :  { %858 = vmatprep.subr.msk.bf16.mxu1 %vm411_vm1, %v1211_v41 }
  0xa3   :  { %675 = vmatpush2.bf16.msra.mxu0 %v1217_v43 }
  0xa4   :  { %716 = vmatpush2.bf16.msra.mxu1 %v1229_v45  ;;  %676 = vmatprep.subr.bf16.mxu0 %v1224_v44 }
  0xa5   :  { %717 = vmatprep.subr.bf16.mxu1 %v1234_v46 }
  0xa7   :  { %677 = vmatpush2.bf16.msra.mxu0 %v1240_v47 }
  0xa8   :  { %718 = vmatpush2.bf16.msra.mxu1 %v1247_v48  ;;  %678 = vmatprep.subr.bf16.mxu0 %v1252_v49 }
  0xa9   :  { %719 = vmatprep.subr.bf16.mxu1 %v1258_v50 }
  0xab   :  { %679 = vmatpush2.bf16.msra.mxu0 %v1263_v51 }
  0xac   :  { %720 = vmatpush2.bf16.msra.mxu1 %v1269_v52  ;;  %680 = vmatprep.subr.bf16.mxu0 %v1276_v53 }
  0xad   :  { %721 = vmatprep.subr.bf16.mxu1 %v1282_v54 }
  0xaf   :  { %681 = vmatpush2.bf16.msra.mxu0 %v1294_v57 }
  0xb0   :  { %722 = vmatpush2.bf16.msra.mxu1 %v1587_v9  ;;  %682 = vmatprep.subr.bf16.mxu0 %v1588_v10 }
  0xb1   :  { %723 = vmatprep.subr.bf16.mxu1 %v1589_v13 }
  0xb3   :  { %683 = vmatpush2.bf16.msra.mxu0 %v1323_v5 }
  0xb4   :  { %724 = vmatpush2.bf16.msra.mxu1 %v1590_v14  ;;  %684 = vmatprep.subr.bf16.mxu0 %v1335_v11 }
  0xb5   :  { %725 = vmatprep.subr.bf16.mxu1 %v1591_v16 }
  0xb7   :  { %685 = vmatpush2.bf16.msra.mxu0 %v1592_v18 }
  0xb8   :  { %726 = vmatpush2.bf16.msra.mxu1 %v1593_v19  ;;  %686 = vmatprep.subr.bf16.mxu0 %v1585_v42 }
  0xb9   :  { %727 = vmatprep.subr.bf16.mxu1 %v1586_v62 }
  0xbb   :  { %687 = vmatpush2.bf16.msra.mxu0 %v1374_v58 }
  0xbc   :  { %728 = vmatpush2.bf16.msra.mxu1 %v1594_v20  ;;  %688 = vmatprep.subr.bf16.mxu0 %v1386_v60  ;;  %v860_v60 = vld [vmem:[%s1559_s2] ss:$0 sm:$0xff] }
  0xbd   :  { %729 = vmatprep.subr.bf16.mxu1 %v1392_v2 }
  0xbf   :  { %689 = vmatpush2.bf16.msra.mxu0 %v1398_v12 }
  0xc0   :  { %730 = vmatpush2.bf16.msra.mxu1 %v1405_v56 }
  0xc2   :  { %691 = vmatmul.mubr.bf16.vlgmr.msra.gmra.mxu0 %v648_v22 }
  0xc3   :  { %732 = vmatmul.mubr.bf16.vlgmr.msra.gmra.mxu1 %v650_v23 }
 0x102   :  { %v452_v24 = vpop.f32.mrf.mxu0 }
 0x103   :  { %v493_v25 = vpop.f32.mrf.mxu1 }
 0x104   :  { %v494_v26 = vadd.f32 %v493_v25, %v452_v24  ;;  %v454_v27 = vpop.f32.mrf.mxu0 }
 0x105   :  { %v495_v28 = vpop.f32.mrf.mxu1 }
 0x106   :  { %v496_v29 = vadd.f32 %v495_v28, %v454_v27  ;;  %v456_v30 = vpop.f32.mrf.mxu0 }
 0x107   :  { %v497_v31 = vpop.f32.mrf.mxu1 }
 0x108   :  { %v457_v32 = vpop.f32.mrf.mxu0 }
 0x109   :  { %v498_v33 = vpop.f32.mrf.mxu1 }
 0x142   :  { %v571_v34 = vpop.f32.mrf.mxu0 }
 0x143   :  { %v612_v35 = vpop.f32.mrf.mxu1 }
 0x144   :  { %v573_v36 = vpop.f32.mrf.mxu0  ;;  %v613_v46 = vadd.f32 %v612_v35, %v571_v34 }
 0x145   :  { %v614_v38 = vpop.f32.mrf.mxu1 }
 0x146   :  { %v615_v39 = vadd.f32 %v614_v38, %v573_v36  ;;  %v575_v40 = vpop.f32.mrf.mxu0  ;;  %v619_v49 = vmax.f32 %v494_v26, %v613_v46 }
 0x147   :  { %v616_v41 = vpop.f32.mrf.mxu1 }
 0x148   :  { %v620_v43 = vmax.f32 %v496_v29, %v615_v39  ;;  %v576_v44 = vpop.f32.mrf.mxu0 }
 0x149   :  { %v617_v45 = vpop.f32.mrf.mxu1 }
 0x182   :  { %v692_v47 = vpop.f32.mrf.mxu0 }
 0x183   :  { %v733_v48 = vpop.f32.mrf.mxu1 }
 0x184   :  { %v734_v50 = vadd.f32 %v733_v48, %v692_v47  ;;  %v694_v51 = vpop.f32.mrf.mxu0 }
 0x185   :  { %v735_v52 = vpop.f32.mrf.mxu1 }
 0x186   :  { %v740_v53 = vmax.f32 %v619_v49, %v734_v50  ;;  %v736_v54 = vadd.f32 %v735_v52, %v694_v51  ;;  %v696_v57 = vpop.f32.mrf.mxu0 }
 0x187   :  { %v737_v61 = vpop.f32.mrf.mxu1 }
 0x188   :  { %747 = vrot.lane.b32.xlu1 %v740_v53, %s973_s1  ;;  %743 = vrot.lane.b32.xlu0 %v740_v53, %s974_s18  ;;  %v697_v62 = vpop.f32.mrf.mxu0  ;;  %v741_v5 = vmax.f32 %v620_v43, %v736_v54 }
 0x189   :  { %v738_v63 = vpop.f32.mrf.mxu1 }
 0x18c   :  { %751 = vrot.lane.b32.xlu0 %v740_v53, %s975_s19  ;;  %757 = vrot.lane.b32.xlu1 %v741_v5, %s974_s18 }
 0x1fa   :  { %v744_v11 = vpop.permute.xlu0 %743  ;;  %v748_v37 = vpop.permute.xlu1 %747 }
 0x1fb   :  { %v746_v15 = vmax.f32 %v740_v53, %v744_v11 }
 0x1fd   :  { %v750_v12 = vmax.f32 %v746_v15, %v748_v37 }
 0x1fe   :  { %v752_v56 = vpop.permute.xlu0 %751  ;;  %v758_v2 = vpop.permute.xlu1 %757 }
 0x1ff   :  { %v754_v58 = vmax.f32 %v750_v12, %v752_v56 }
 0x201   :  { %v755_v59 = vmax.f32 %v754_v58, %v741_v5 }
 0x203   :  { %v760_v17 = vmax.f32 %v755_v59, %v758_v2 }
 0x205   :  { %v768_v55 = vadd.f32 %v860_v60, %v760_v17 }
 0x207   :  { %v769_v42 = vmax.f32 %v768_v55, 0.0 }
 0x209   :  { %771 = vst.msk [vmem:[%s1560_s3] sm:$0xff] %vm770_vm4, %v769_v42 }

</bundles_post_ra>
